<compile_context>
chip_gen: v7x
topology: tpu7x:2x2x1
jax: 0.10.0
libtpu: 0.0.40
codegen_flags: <defaults>
</compile_context>

<pallas_src>
import jax
import jax.numpy as jnp
from jax.experimental import pallas as pl
from jax.experimental.pallas import tpu as pltpu


def _gin_kernel(adj_ref, x_ref, w_ref, o_ref, xprev_ref):
    """One adjacency group g of the GIN forward (whole batch folded into lanes).

    adj_ref   : VMEM [1, N, N]              A_norm[g] + (1+eps)*I, bf16
    x_ref     : VMEM [1, N, C*B*Fg]         features of group g, lanes=(c,b,fg), bf16
    w_ref     : VMEM [1, C*B*Fg, Co*B*Fg]   kron-expanded grouped weight, bf16
    o_ref     : VMEM [1, N, Co*B*Fg]        output tile, lanes=(o,b,fg), f32
    xprev_ref : VMEM [N, C*B*Fg] bf16       scratch carrying group g-1's features
    """
    g = pl.program_id(0)

    # Group 0 has no inter-group skip: zero the carry so the add below is a no-op.
    @pl.when(g == 0)
    def _():
        xprev_ref[...] = jnp.zeros_like(xprev_ref)

    A = adj_ref[0]                                   # [N, N]        bf16
    X = x_ref[0]                                     # [N, C*B*Fg]   bf16

    # (1+eps)*x + A_norm x  in a single MXU dot (self-loop folded into A's diag).
    agg = jnp.dot(A, X, preferred_element_type=jnp.float32)      # [N, C*B*Fg] f32
    # Add the inter-group skip x[g-1] (bf16 carry, promoted to f32), then round
    # once to bf16 for the second MXU dot.
    pre = (agg + xprev_ref[...]).astype(jnp.bfloat16)            # [N, C*B*Fg] bf16
    # Carry this group's features to group g+1 (read-before-write above).
    xprev_ref[...] = X

    # Grouped 1x1 conv == per-group channel mix: one MXU dot against the
    # kron-expanded weight; single dense full-lane-width store of the tile.
    o_ref[0] = jnp.dot(pre, w_ref[0],
                       preferred_element_type=jnp.float32).astype(o_ref.dtype)


def _pad_to(n, m):
    return ((n + m - 1) // m) * m


def _vmem_limit_bytes(N, CB, CoB):
    """Padded, double-buffered VMEM footprint of one grid step + headroom."""
    adj = _pad_to(N, 16) * _pad_to(N, 128) * 2        # bf16
    xsl = _pad_to(N, 16) * _pad_to(CB, 128) * 2       # bf16
    wex = _pad_to(CB, 16) * _pad_to(CoB, 128) * 2     # bf16
    osl = _pad_to(N, 8) * _pad_to(CoB, 128) * 4       # f32
    carry = _pad_to(N, 16) * _pad_to(CB, 128) * 2     # bf16 scratch (single buffer)
    need = 2 * (adj + xsl + wex + osl) + carry        # inputs/outputs double-buffered
    # 2x headroom, floor 16 MiB, cap 56 MiB so the limit also fits v7x's 64 MiB VMEM.
    return int(min(max(2 * need, 16 << 20), 56 << 20))


def dense_gin_conv2d(x, adj, weight, eps, *, add_loop=True):
    """Pallas implementation of DenseGINConv2d.forward.

    x      : [B, C, N, F] float32
    adj    : [G, N, N]    float32
    weight : [G, Co, C]   grouped 1x1-conv weight (Conv2d weight [G*Co, C, 1, 1] regrouped)
    eps    : [1]          trainable epsilon
    returns: [B, Co, N, F] float32
    """
    B, C, N, F = x.shape
    G = adj.shape[0]
    assert adj.shape == (G, N, N) and F % G == 0
    Fg = F // G
    Co = weight.shape[1]
    BFg = B * Fg
    CB, CoB = C * BFg, Co * BFg

    # --- adjacency: D^-1/2 A D^-1/2 (matches norm(add_loop=False)), then fold
    #     (1+eps)*I into the diagonal in f32 before the bf16 cast. ---
    deg = jnp.maximum(jnp.sum(adj, axis=-1), 1.0)                 # clamp(min=1)
    dis = jax.lax.rsqrt(deg)                                      # [G, N]
    adj_n = dis[:, :, None] * adj * dis[:, None, :]
    if add_loop:
        adj_n = adj_n + (1.0 + eps[0]) * jnp.eye(N, dtype=jnp.float32)[None]
    adj_bf = adj_n.astype(jnp.bfloat16)

    # --- x: [B,C,N,F] -> [G, N, C*B*Fg]  (lanes = (c, b, fg)) ---
    # TODO(synk): for exact f32 fidelity of the skip term, pass a second f32 copy
    # of x for the VPU path (costs extra HBM traffic); bf16-rounded here.
    xr = (x.reshape(B, C, N, G, Fg)
           .transpose(3, 2, 1, 0, 4)
           .reshape(G, N, CB)
           .astype(jnp.bfloat16))

    # --- kron-expanded grouped weight: W_exp[g] = kron(W[g]^T, I_{B*Fg}), bf16 ---
    eye = jnp.eye(BFg, dtype=jnp.float32)
    w_exp = (jnp.einsum('goc,jk->gcjok', weight.astype(jnp.float32), eye)
               .reshape(G, CB, CoB)
               .astype(jnp.bfloat16))

    out = pl.pallas_call(
        _gin_kernel,
        out_shape=jax.ShapeDtypeStruct((G, N, CoB), jnp.float32),
        grid_spec=pltpu.PrefetchScalarGridSpec(
            num_scalar_prefetch=0,
            grid=(G,),
            in_specs=[
                pl.BlockSpec((1, N, N), lambda g: (g, 0, 0)),      # adj'[g]
                pl.BlockSpec((1, N, CB), lambda g: (g, 0, 0)),     # x slab of group g
                pl.BlockSpec((1, CB, CoB), lambda g: (g, 0, 0)),   # kron weight of g
            ],
            out_specs=pl.BlockSpec((1, N, CoB), lambda g: (g, 0, 0)),
            scratch_shapes=[pltpu.VMEM((N, CB), jnp.bfloat16)],    # x[g-1] carry (bf16)
        ),
        compiler_params=pltpu.CompilerParams(
            # g must stay serial because of the x[g-1] scratch carry.
            dimension_semantics=("arbitrary",),
            vmem_limit_bytes=_vmem_limit_bytes(N, CB, CoB),
        ),
    )(adj_bf, xr, w_exp)

    # [G, N, Co, B, Fg] -> [B, Co, N, G, Fg] -> [B, Co, N, F]  (matches torch layout)
    return (out.reshape(G, N, Co, B, Fg)
               .transpose(3, 2, 1, 0, 4)
               .reshape(B, Co, N, F))


def ref_forward(x, adj, weight, eps, add_loop=True):
    """Pure-JAX f32 reference mirroring the PyTorch forward."""
    B, C, N, F = x.shape
    G = adj.shape[0]
    Fg = F // G
    Co = weight.shape[1]
    deg = jnp.maximum(adj.sum(-1), 1.0)
    dis = jax.lax.rsqrt(deg)
    adj_n = dis[:, :, None] * adj * dis[:, None, :]
    xr = x.reshape(B, C, N, G, Fg).transpose(0, 1, 3, 2, 4)       # [B,C,G,N,Fg]
    out = jnp.einsum('gmn,bcgnf->bcgmf', adj_n, xr)
    out = out.at[:, :, 1:].add(xr[:, :, :-1])
    if add_loop:
        out = (1.0 + eps[0]) * xr + out
    out = jnp.einsum('goc,bcgnf->bognf', weight, out)             # [B,Co,G,N,Fg]
    return out.transpose(0, 1, 3, 2, 4).reshape(B, Co, N, F)


def ref_mirror(x, adj, weight, eps, add_loop=True):
    """Pure-JAX mirror of the kernel's exact bf16 rounding points (tight check)."""
    B, C, N, F = x.shape
    G = adj.shape[0]
    Fg = F // G
    Co = weight.shape[1]
    BFg = B * Fg
    deg = jnp.maximum(adj.sum(-1), 1.0)
    dis = jax.lax.rsqrt(deg)
    adj_n = dis[:, :, None] * adj * dis[:, None, :]
    if add_loop:
        adj_n = adj_n + (1.0 + eps[0]) * jnp.eye(N, dtype=jnp.float32)[None]
    A = adj_n.astype(jnp.bfloat16)
    X = (x.reshape(B, C, N, G, Fg).transpose(3, 2, 1, 0, 4)
          .reshape(G, N, C * BFg).astype(jnp.bfloat16))
    eye = jnp.eye(BFg, dtype=jnp.float32)
    Wexp = (jnp.einsum('goc,jk->gcjok', weight.astype(jnp.float32), eye)
              .reshape(G, C * BFg, Co * BFg).astype(jnp.bfloat16))
    outs = []
    xprev = jnp.zeros((N, C * BFg), jnp.bfloat16)
    for g in range(G):
        agg = jnp.dot(A[g], X[g], preferred_element_type=jnp.float32)
        pre = (agg + xprev.astype(jnp.float32)).astype(jnp.bfloat16)
        xprev = X[g]
        outs.append(jnp.dot(pre, Wexp[g], preferred_element_type=jnp.float32))
    out = jnp.stack(outs)                                          # [G, N, Co*B*Fg]
    return (out.reshape(G, N, Co, B, Fg)
               .transpose(3, 2, 1, 0, 4)
               .reshape(B, Co, N, F))


if __name__ == "__main__":
    B, C, N, F, G, Co = 2, 4, 16, 16, 2, 8

    key = jax.random.PRNGKey(0)
    kx, ka, kw = jax.random.split(key, 3)
    x = jax.random.normal(kx, (B, C, N, F), dtype=jnp.float32)
    adj = jax.random.uniform(ka, (G, N, N), dtype=jnp.float32)

    # Conv2d-style init: kaiming_uniform(a=sqrt(5)) => U(-1/sqrt(fan_in), +), fan_in = C.
    bound = 1.0 / (C ** 0.5)
    weight = jax.random.uniform(kw, (G, Co, C), dtype=jnp.float32,
                                minval=-bound, maxval=bound)
    eps = jnp.zeros((1,), dtype=jnp.float32)

    out = dense_gin_conv2d(x, adj, weight, eps, add_loop=True)
    out = jax.block_until_ready(out)
    assert out.shape == (B, Co, N, F), out.shape

    # Tight check against a pure-JAX mirror using the kernel's exact bf16 rounding.
    ref_m = ref_mirror(x, adj, weight, eps, add_loop=True)
    err_m = float(jnp.max(jnp.abs(out - ref_m)))
    assert jnp.allclose(out, ref_m, atol=2e-3, rtol=2e-3), err_m

    # Loose sanity check against the pure-f32 reference (bf16-cast numerics).
    ref_f = ref_forward(x, adj, weight, eps, add_loop=True)
    err_f = float(jnp.max(jnp.abs(out - ref_f)))
    assert jnp.allclose(out, ref_f, atol=1e-1, rtol=1e-1), err_f

    print("KERNEL_OK")
</pallas_src>

<mosaic_0001>
module attributes {stable_mosaic.version = 11 : i64} {
  func.func @_gin_kernel(%arg0: i32, %arg1: memref<1x16x16xbf16, #tpu.memory_space<vmem>>, %arg2: memref<1x16x64xbf16, #tpu.memory_space<vmem>>, %arg3: memref<1x64x128xbf16, #tpu.memory_space<vmem>>, %arg4: memref<1x16x128xf32, #tpu.memory_space<vmem>>, %arg5: memref<16x64xbf16, #tpu.memory_space<vmem>>) attributes {dimension_semantics = [#tpu.dimension_semantics<arbitrary>], iteration_bounds = array<i64: 2>, scalar_prefetch = 0 : i64, scratch_operands = 1 : i64, tpu.core_type = #tpu.core_type<tc>, window_params = [{transform_indices = @transform_0, window_bounds = array<i64: 1, 16, 16>}, {transform_indices = @transform_1, window_bounds = array<i64: 1, 16, 64>}, {transform_indices = @transform_2, window_bounds = array<i64: 1, 64, 128>}, {transform_indices = @transform_3, window_bounds = array<i64: 1, 16, 128>}]} {
    %c0_i32 = arith.constant 0 : i32
    %0 = arith.cmpi eq, %arg0, %c0_i32 : i32
    %1 = arith.extui %0 : i1 to i32
    %c0_i32_0 = arith.constant 0 : i32
    %2 = arith.cmpi ne, %1, %c0_i32_0 : i32
    scf.if %2 {
      %cst_17 = arith.constant 0.000000e+00 : bf16
      %19 = vector.broadcast %cst_17 : bf16 to vector<16x64xbf16>
      %c0_18 = arith.constant 0 : index
      %c0_19 = arith.constant 0 : index
      %20 = vector.load %arg5[%c0_18, %c0_19] : memref<16x64xbf16, #tpu.memory_space<vmem>>, vector<16x64xbf16>
      tpu.vector_store %arg5[%c0_18, %c0_19], %19 {strides = array<i32>} : memref<16x64xbf16, #tpu.memory_space<vmem>>, vector<16x64xbf16>,
    } else {
    }
    %c0 = arith.constant 0 : index
    %c0_1 = arith.constant 0 : index
    %c0_2 = arith.constant 0 : index
    %3 = vector.load %arg1[%c0, %c0_1, %c0_2] : memref<1x16x16xbf16, #tpu.memory_space<vmem>>, vector<1x16x16xbf16>
    %4 = vector.shape_cast %3 : vector<1x16x16xbf16> to vector<16x16xbf16>
    %c0_3 = arith.constant 0 : index
    %c0_4 = arith.constant 0 : index
    %c0_5 = arith.constant 0 : index
    %5 = vector.load %arg2[%c0_3, %c0_4, %c0_5] : memref<1x16x64xbf16, #tpu.memory_space<vmem>>, vector<1x16x64xbf16>
    %6 = vector.shape_cast %5 : vector<1x16x64xbf16> to vector<16x64xbf16>
    %cst = arith.constant dense<0.000000e+00> : vector<16x64xf32>
    %7 = tpu.matmul %4, %6, %cst {dimension_numbers = #tpu.dot_dimension_numbers<[1], [0], [0], [1], [0, 0, 1, 1], [], []>} : vector<16x16xbf16>, vector<16x64xbf16>, vector<16x64xf32> -> vector<16x64xf32>
    %c0_6 = arith.constant 0 : index
    %c0_7 = arith.constant 0 : index
    %8 = vector.load %arg5[%c0_6, %c0_7] : memref<16x64xbf16, #tpu.memory_space<vmem>>, vector<16x64xbf16>
    %9 = arith.extf %8 : vector<16x64xbf16> to vector<16x64xf32>
    %10 = arith.addf %7, %9 : vector<16x64xf32>
    %11 = arith.truncf %10 : vector<16x64xf32> to vector<16x64xbf16>
    %c0_8 = arith.constant 0 : index
    %c0_9 = arith.constant 0 : index
    %12 = vector.load %arg5[%c0_8, %c0_9] : memref<16x64xbf16, #tpu.memory_space<vmem>>, vector<16x64xbf16>
    tpu.vector_store %arg5[%c0_8, %c0_9], %6 {strides = array<i32>} : memref<16x64xbf16, #tpu.memory_space<vmem>>, vector<16x64xbf16>,
    %c0_10 = arith.constant 0 : index
    %c0_11 = arith.constant 0 : index
    %c0_12 = arith.constant 0 : index
    %13 = vector.load %arg3[%c0_10, %c0_11, %c0_12] : memref<1x64x128xbf16, #tpu.memory_space<vmem>>, vector<1x64x128xbf16>
    %14 = vector.shape_cast %13 : vector<1x64x128xbf16> to vector<64x128xbf16>
    %cst_13 = arith.constant dense<0.000000e+00> : vector<16x128xf32>
    %15 = tpu.matmul %11, %14, %cst_13 {dimension_numbers = #tpu.dot_dimension_numbers<[1], [0], [0], [1], [0, 0, 1, 1], [], []>} : vector<16x64xbf16>, vector<64x128xbf16>, vector<16x128xf32> -> vector<16x128xf32>
    %c0_14 = arith.constant 0 : index
    %c0_15 = arith.constant 0 : index
    %c0_16 = arith.constant 0 : index
    %16 = vector.load %arg4[%c0_14, %c0_15, %c0_16] : memref<1x16x128xf32, #tpu.memory_space<vmem>>, vector<1x16x128xf32>
    %17 = vector.shape_cast %16 : vector<1x16x128xf32> to vector<16x128xf32>
    %18 = vector.shape_cast %15 : vector<16x128xf32> to vector<1x16x128xf32>
    tpu.vector_store %arg4[%c0_14, %c0_15, %c0_16], %18 {strides = array<i32>} : memref<1x16x128xf32, #tpu.memory_space<vmem>>, vector<1x16x128xf32>,
    return
  }
  func.func @transform_0(%arg0: i32) -> (i32, i32, i32) {
    %c0_i32 = arith.constant 0 : i32
    %c0_i32_0 = arith.constant 0 : i32
    %c0_i32_1 = arith.constant 0 : i32
    return %arg0, %c0_i32, %c0_i32_0 : i32, i32, i32
  }
  func.func @transform_1(%arg0: i32) -> (i32, i32, i32) {
    %c0_i32 = arith.constant 0 : i32
    %c0_i32_0 = arith.constant 0 : i32
    %c0_i32_1 = arith.constant 0 : i32
    return %arg0, %c0_i32, %c0_i32_0 : i32, i32, i32
  }
  func.func @transform_2(%arg0: i32) -> (i32, i32, i32) {
    %c0_i32 = arith.constant 0 : i32
    %c0_i32_0 = arith.constant 0 : i32
    %c0_i32_1 = arith.constant 0 : i32
    return %arg0, %c0_i32, %c0_i32_0 : i32, i32, i32
  }
  func.func @transform_3(%arg0: i32) -> (i32, i32, i32) {
    %c0_i32 = arith.constant 0 : i32
    %c0_i32_0 = arith.constant 0 : i32
    %c0_i32_1 = arith.constant 0 : i32
    return %arg0, %c0_i32, %c0_i32_0 : i32, i32, i32
  }
}

</mosaic_0001>

<bundles_post_ra>
// kernel: tpu_custom_call.1
= control target key start
LH: loop header
LB: loop body
LE: loop exit
PB: predicated region body
PF: predicated region fallthrough
CT: control target
= control target key end

     0   :  { %s1133_s0 = inlined_call_operand.hbm [shape: bf16[2,16,16], index: 0, kind: input, shape index: {}]   ;;  %s1134_s1 = inlined_call_operand.hbm [shape: bf16[2,16,64], index: 1, kind: input, shape index: {}]   ;;  %s1135_s2 = inlined_call_operand.hbm [shape: bf16[2,64,128], index: 2, kind: input, shape index: {}]   ;;  %s1136_s3 = inlined_call_operand.hbm [shape: f32[2,16,128], index: 3, kind: output, shape index: {}]  }
   0x1   :  { %1143 = sst [smem:[#allocation13_spill]] %s1133_s0 }
   0x2   :  { %8 = vsyncpa [#allocation4], 0 }
   0x3   :  { %10 = vsyncpa [#allocation4 + $0x1], 0 }
   0x4   :  { %11 = vsyncpa [#allocation7], 0 }
   0x5   :  { %13 = vsyncpa [#allocation7 + $0x1], 0 }
   0x6   :  { %14 = vsyncpa [#allocation5], 0 }
   0x7   :  { %16 = vsyncpa [#allocation5 + $0x1], 0  ;;  %s869_s12 = smov 0   ;;  %s871_s13 = smov 0  }
   0x8   :  { %s873_s14 = smov 0   ;;  %s875_s15 = smov 0  }
   0x9 LB: > { %s890_s16 = sadd.s32 4294967295, %s836_s15   ;;  %s547_s17 = sadd.s32 4294967294, %s836_s15   ;;  %s836_s15 = sphi %s875_s15, %s1162_s15   ;;  %s832_s14 = sphi %s873_s14, %s1161_s14   ;;  %s828_s13 = sphi %s871_s13, %s1160_s13   ;;  %s824_s12 = sphi %s869_s12, %s1159_s12  }
   0xa   : > { %s894_s18 = sadd.s32 1, %s836_s15   ;;  %s29_s19 = sadd.s32 1, %s832_s14 }
   0xb   : > { %s26_s20 = ssub.s32 %s836_s15, %s894_s18  ;;  %p36_p0 = scmp.ne.s32.totalorder %s832_s14, %s828_s13 }
   0xc   : > { %p27_p1 = scmp.eq.s32.totalorder %s26_s20, 0  ;;  %p37_p2 = scmp.eq.s32.totalorder %s836_s15, 0 }
   0xd   : > { %p42_p3 = scmp.ne.s32.totalorder %s828_s13, %s824_s12  ;;  %p43_p4 = scmp.eq.s32.totalorder %s890_s16, 0 }
   0xe   : > { %s906_s21 = scalar_select %p27_p1, %s832_s14, %s29_s19  }
   0xf   : > { %p38_p5 = por %p37_p2, %p36_p0  ;;  %p908_p6 = por %p43_p4, %p42_p3 }
  0x10   : > { %p118_p7 = scmp.eq.s32.totalorder %s890_s16, 1  ;;  %p124_p8 = scmp.eq.s32.totalorder %s547_s17, 1 }
  0x11   : > { %s1144_s22 = scalar_select %p908_p6, 1, 0 }
  0x12   : > { %p629_p10 = scmp.lt.s32.totalorder %s836_s15, 2  ;;  %p915_p11 = por %p118_p7, %p36_p0 }
  0x13   : > { %p919_p12 = por %p124_p8, %p42_p3  ;;  %s924_s25 = sand.u32 1, %s832_s14  }
  0x14   : > { %s1145_s23 = scalar_select %p915_p11, 1, 0 }
  0x15   : > { %s1146_s24 = scalar_select %p919_p12, 1, 0 }
  0x16   : > { %s578_s26 = sshll.u32 %s836_s15, 7  ;;  %s550_s27 = sshll.u32 %s924_s25, 3 }
  0x17   : > { %p928_p13 = pnand %p629_p10, %p38_p5  ;;  %s165_s29 = sand.u32 1, %s836_s15  }
  0x18   : > { %s938_s5 = scalar_lea.hbm %s1134_s1, %s578_s26  ;;  %s169_s6 = scalar_lea.vmem [#allocation6], %s550_s27 }
  0x19   : > { %s176_s7 = sshll.u32 %s169_s6, 4  ;;  %s945_s8 = scalar_lea.sflag [#allocation7], %s165_s29  ;;  %s942_s7 = int_to_ptr.vmem [resolvable:$true] %s176_s7 }
  0x1a   : > { %s676_s9 = scalar_lea.hbm %s938_s5, 128  ;;  %p951_p2 = pneg %p928_p13 }
  0x1b   : > { %p677_p1 = scmp.ne.s32.totalorder %s938_s5, %s676_s9  ;;  %s681_s19 = scalar_lea.hbm %s1134_s1, 256 }
  0x1c   : > { %p682_p5 = scmp.lt.u32.totalorder %s938_s5, %s1134_s1  ;;  %p683_p7 = scmp.lt.u32.totalorder %s681_s19, %s676_s9 }
  0x1d   : > { %p679_p3 = pnand %p951_p2, %p677_p1  ;;  %p685_p10 = scmp.lt.u32.totalorder %s676_s9, %s938_s5 }
  0x1e   : > { %p684_p8 = por %p683_p7, %p682_p5 }
  0x1f   : > { %p680_p4 = pneg %p679_p3 }
  0x20   : > { %p686_p9 = por %p685_p10, %p684_p8 }
  0x22   : > { %p687_p0 = pnand %p686_p9, %p680_p4 }
  0x24   : > { %690 = shalt.err (!%p687_p0)
}
  0x25   : > { %s691_s29 = scalar_lea.vmem %s942_s7, 128  ;;  %s838_s4 = smov [#allocation6]  }
  0x26   : > { %p692_p1 = scmp.ne.s32.totalorder %s942_s7, %s691_s29  ;;  %s696_s6 = sshll.u32 %s838_s4, 4  ;;  %s697_s6 = int_to_ptr.vmem [resolvable:$false] %s696_s6 }
  0x27   : > { %s698_s11 = scalar_lea.vmem %s697_s6, 256  ;;  %p699_p11 = scmp.lt.s32.totalorder %s942_s7, %s697_s6 }
  0x28   : > { %p694_p3 = pnand %p692_p1, %p951_p2  ;;  %p700_p6 = scmp.lt.s32.totalorder %s698_s11, %s691_s29 }
  0x2a   : > { %p695_p12 = pneg %p694_p3  ;;  %p701_p5 = por %p700_p6, %p699_p11 }
  0x2c   : > { %p702_p7 = pnand %p701_p5, %p695_p12 }
  0x2e   : > { %705 = shalt.err (!%p702_p7)
}
  0x2f   : > { %s1139_s9 = smov 64   ;;  %s1141_s17 = smov 4  }
  0x30   : > { %621 = dma.hbm_to_vmem [thread:$0]  (!%p928_p13), %s938_s5, 128, %s942_s7, %s945_s8, %s1139_s9, %s1139_s9, %s1141_s17  }
  0x31   : > { %p205_p6 = scmp.lt.s32.totalorder %s836_s15, 3  ;;  %s1149_s0 = sld [smem:[#allocation13_spill]] }
  0x32   : > { %p1150_p9 = scmp.ge.s32.totalorder %s836_s15, 1  ;;  %s148_s4 = scalar_lea.vmem [#allocation3], %s550_s27 }
  0x33   : > { %s155_s6 = sshll.u32 %s148_s4, 4  ;;  %s556_s5 = sshll.u32 %s924_s25, 5  ;;  %s994_s6 = int_to_ptr.vmem [resolvable:$true] %s155_s6 }
  0x34   : > { %p988_p11 = pnand %p1150_p9, %p205_p6  ;;  %s145_s7 = scalar_lea.sflag [#allocation4], %s924_s25 }
  0x36   : > { %s1151_s29 = scalar_select %p988_p11, 1, 0 }
  0x37   : > { %s984_s30 = scalar_lea.hbm %s1149_s0, %s578_s26  ;;  %s711_s20 = scalar_lea.hbm %s1149_s0, 256 }
  0x38   : > { %s706_s11 = scalar_lea.hbm %s984_s30, 128  ;;  %p712_p8 = scmp.lt.u32.totalorder %s984_s30, %s1149_s0 }
  0x39   : > { %p707_p12 = scmp.ne.s32.totalorder %s984_s30, %s706_s11  ;;  %p713_p10 = scmp.lt.u32.totalorder %s711_s20, %s706_s11 }
  0x3a   : > { %p715_p3 = scmp.lt.u32.totalorder %s706_s11, %s984_s30 }
  0x3b   : > { %p709_p0 = pnand %p707_p12, %p951_p2  ;;  %p714_p1 = por %p713_p10, %p712_p8 }
  0x3d   : > { %p710_p4 = pneg %p709_p0  ;;  %p716_p5 = por %p715_p3, %p714_p1 }
  0x3f   : > { %p717_p7 = pnand %p716_p5, %p710_p4 }
  0x41   : > { %720 = shalt.err (!%p717_p7)
}
  0x42   : > { %s721_s27 = scalar_lea.vmem %s994_s6, 128  ;;  %s841_s4 = smov [#allocation3]  }
  0x43   : > { %p722_p6 = scmp.ne.s32.totalorder %s994_s6, %s721_s27  ;;  %s726_s26 = sshll.u32 %s841_s4, 4  ;;  %s727_s26 = int_to_ptr.vmem [resolvable:$false] %s726_s26 }
  0x44   : > { %s728_s9 = scalar_lea.vmem %s727_s26, 256  ;;  %p729_p0 = scmp.lt.s32.totalorder %s994_s6, %s727_s26 }
  0x45   : > { %p724_p9 = pnand %p722_p6, %p951_p2  ;;  %p730_p11 = scmp.lt.s32.totalorder %s728_s9, %s721_s27 }
  0x47   : > { %p725_p12 = pneg %p724_p9  ;;  %p731_p8 = por %p730_p11, %p729_p0 }
  0x49   : > { %p732_p10 = pnand %p731_p8, %p725_p12 }
  0x4b   : > { %735 = shalt.err (!%p732_p10)
}
  0x4c   : > { %s1152_s17 = smov 4   ;;  %s1153_s11 = smov 64  }
  0x4d   : > { %618 = dma.hbm_to_vmem [thread:$0]  (!%p928_p13), %s984_s30, 128, %s994_s6, %s145_s7, %s1153_s11, %s1153_s11, %s1152_s17  }
  0x4e   : > { %s580_s19 = sshll.u32 %s836_s15, 9  ;;  %s190_s26 = scalar_lea.vmem [#allocation8], %s556_s5 }
  0x4f   : > { %s1028_s27 = scalar_lea.hbm %s1135_s2, %s580_s19  ;;  %s197_s9 = sshll.u32 %s190_s26, 4  ;;  %s1032_s9 = int_to_ptr.vmem [resolvable:$true] %s197_s9 }
  0x50   : > { %s736_s0 = scalar_lea.hbm %s1028_s27, 512  ;;  %s741_s7 = scalar_lea.hbm %s1135_s2, 1024 }
  0x51   : > { %p737_p11 = scmp.ne.s32.totalorder %s1028_s27, %s736_s0  ;;  %p742_p3 = scmp.lt.u32.totalorder %s1028_s27, %s1135_s2 }
  0x52   : > { %p743_p5 = scmp.lt.u32.totalorder %s741_s7, %s736_s0  ;;  %p745_p6 = scmp.lt.u32.totalorder %s736_s0, %s1028_s27 }
  0x53   : > { %p739_p4 = pnand %p737_p11, %p951_p2 }
  0x54   : > { %p744_p7 = por %p743_p5, %p742_p3 }
  0x55   : > { %p740_p1 = pneg %p739_p4 }
  0x56   : > { %p746_p9 = por %p745_p6, %p744_p7 }
  0x58   : > { %p747_p12 = pnand %p746_p9, %p740_p1 }
  0x5a   : > { %750 = shalt.err (!%p747_p12)
}
  0x5b   : > { %s751_s25 = scalar_lea.vmem %s1032_s9, 512  ;;  %s842_s5 = smov [#allocation8]  }
  0x5c   : > { %p752_p0 = scmp.ne.s32.totalorder %s1032_s9, %s751_s25  ;;  %s756_s4 = sshll.u32 %s842_s5, 4  ;;  %s757_s4 = int_to_ptr.vmem [resolvable:$false] %s756_s4 }
  0x5d   : > { %s758_s26 = scalar_lea.vmem %s757_s4, 1024  ;;  %p759_p11 = scmp.lt.s32.totalorder %s1032_s9, %s757_s4 }
  0x5e   : > { %p754_p8 = pnand %p752_p0, %p951_p2  ;;  %p760_p4 = scmp.lt.s32.totalorder %s758_s26, %s751_s25 }
  0x60   : > { %p755_p10 = pneg %p754_p8  ;;  %p761_p3 = por %p760_p4, %p759_p11 }
  0x62   : > { %p762_p5 = pnand %p761_p3, %p755_p10 }
  0x64   : > { %765 = shalt.err (!%p762_p5)
}
  0x65   : > { %624 = dma.hbm_to_vmem [thread:$0]  (!%p928_p13), %s1028_s27, 512, %s1032_s9, %s945_s8, %s1153_s11, %s1153_s11, %s1152_s17  }
  0x66   : > { %p1154_p2 = scmp.ne.s32.totalorder %s1151_s29, 0 }
  0x67   : > { %s1062_s0 = sand.u32 (!%p1154_p2), 1, %s828_s13   ;;  %p1155_p1 = scmp.ne.s32.totalorder (!%p1154_p2), %s1144_s22, 0 }
  0x68   : > { %209 = sbr.rel (%p1154_p2) target bundleno = 578 (0x242), region = 32  ;;  %s560_s10 = sshll.u32 (!%p1154_p2), %s1062_s0, 3 }
  0x69   : > { %s212_s30 = scalar_lea.sflag (!%p1154_p2), [#allocation4], %s1062_s0  ;;  %s215_s6 = scalar_lea.vmem (!%p1154_p2), [#allocation3], %s560_s10 }
  0x6f   : > { %811 = dma.done.wait (%p1155_p1), %s212_s30, 128  }
  0x70   : > { %813 = vsyncadd (%p1155_p1), %s212_s30, 4294967168  ;;  %s220_s28 = sand.u32 1, %s890_s16   ;;  %s224_s29 = scalar_lea.vmem [#allocation6], %s560_s10 }
  0x71   : > { %s221_s8 = scalar_lea.sflag [#allocation7], %s220_s28 }
  0x72   : > { %815 = dma.done.wait (%p1155_p1), %s221_s8, 640  }
  0x73   : > { %817 = vsyncadd (%p1155_p1), %s221_s8, 4294966656  ;;  %s562_s17 = sshll.u32 %s1062_s0, 5  ;;  %s563_s11 = sshll.u32 %s1062_s0, 4 }
  0x74   : > { %s233_s27 = scalar_lea.vmem [#allocation8], %s562_s17  ;;  %s1077_s9 = scalar_lea.vmem [#allocation9], %s563_s11 }
  0x75   : > { %p564_p13 = scmp.ne.s32.totalorder %s890_s16, 0 }
  0x76   : > { %vm271_vm0 = vcmask (!%p564_p13), 523264   ;;  %v843_v0 = vmov (!%p564_p13), 0  }
  0x77   : > { %270 = sbr.rel (%p564_p13) target bundleno = 126 (0x7e), region = 48  ;;  %272 = vst.msk [vmem:[#allocation2] sm:$0xff] (!%p564_p13), %vm271_vm0, %v843_v0 }
  0x7e PF: > { %v670_v1 = vld [vmem:[%s224_s29] sm:$0xff]   ;;  %v844_v2 = vmov 0.0   ;;  %v671_v3 = vld [vmem:[%s215_s6] sm:$0xff]   ;;  %vm845_vm1 = vmmov 0   ;;  %vm291_vm2 = vcmask 130048   ;;  %vm337_vm3 = vcmask 523264  }
  0x7f   : > { %589 = vmatprep.subr.bf16.mxu0 %v844_v2  ;;  %595 = vmatprep.subr.bf16.mxu1 %v844_v2  ;;  %v672_v4 = vld [vmem:[%s233_s27] sm:$0xff]   ;;  %v673_v5 = vld [vmem:[%s233_s27 + $0x8] sm:$0xff]   ;;  %v674_v6 = vld [vmem:[%s233_s27 + $0x10] sm:$0xff]   ;;  %s581_s22 = sshll.u32 %s890_s16, 8  ;;  %s431_s7 = sshll.u32 %s1077_s9, 4  ;;  %s1087_s7 = int_to_ptr.vmem [resolvable:$true] %s431_s7 }
  0x80   : > { %590 = vmatpush3.bf16.msra.mxu0 %v670_v1  ;;  %591 = vmatprep.mubr.msk.bf16.mxu0 %vm845_vm1, %v844_v2  ;;  %v675_v7 = vld [vmem:[%s233_s27 + $0x18] sm:$0xff]   ;;  %s1085_s25 = scalar_lea.hbm %s1136_s3, %s581_s22  ;;  %s418_s5 = scalar_lea.sflag [#allocation5], %s1062_s0 }
  0x81   : > { %603 = vmatprep.mubr.msk.bf16.mxu1 %vm845_vm1, %v844_v2  ;;  %596 = vmatpush3.bf16.msra.mxu1 %v672_v4  ;;  %v277_v8 = vld [vmem:[#allocation2] sm:$0xff]  ;;  %s766_s4 = scalar_lea.vmem %s1087_s7, 256  ;;  %p1156_p6 = scmp.ne.s32.totalorder %s1145_s23, 0 }
  0x82   : > { %597 = vmatprep.subr.bf16.mxu1 %v844_v2  ;;  %338 = vst.msk [vmem:[#allocation2] sm:$0xff] %vm337_vm3, %v670_v1  ;;  %v278_v9 = vunpack.c.l.bf16 %v277_v8  ;;  %v279_v10 = vunpack.c.h.bf16 %v277_v8  ;;  %p767_p7 = scmp.ne.s32.totalorder %s1087_s7, %s766_s4  ;;  %s846_s16 = smov [#allocation9]  }
  0x83   : > { %592 = vmatmul.mubr.msk.bf16.vlgmr.msra.gmra.mrb[0].mxu0 %vm291_vm2, %v671_v3  ;;  %s770_s26 = sshll.u32 %s846_s16, 4  ;;  %s771_s26 = int_to_ptr.vmem [resolvable:$false] %s770_s26 }
  0x84   : > { %p768_p9 = pnand %p767_p7, %p1156_p6  ;;  %s772_s10 = scalar_lea.vmem %s771_s26, 512 }
  0x85   : > { %598 = vmatpush3.bf16.msra.mxu1 %v673_v5  ;;  %p773_p0 = scmp.lt.s32.totalorder %s1087_s7, %s771_s26  ;;  %p774_p8 = scmp.lt.s32.totalorder %s772_s10, %s766_s4 }
  0x86   : > { %599 = vmatprep.subr.bf16.mxu1 %v844_v2  ;;  %p769_p12 = pneg %p768_p9 }
  0x87   : > { %p775_p10 = por %p774_p8, %p773_p0 }
  0x89   : > { %600 = vmatpush3.bf16.msra.mxu1 %v674_v6  ;;  %p776_p11 = pnand %p775_p10, %p769_p12 }
  0x8a   : > { %601 = vmatprep.subr.bf16.mxu1 %v844_v2 }
  0x8d   : > { %602 = vmatpush3.bf16.msra.mxu1 %v675_v7 }
 0x156   : > { %v329_v11 = vpop.f32.mrb[0].mxu0 }
 0x157   : > { %v593_v12 = vpop.f32.mrb[1].mxu0  ;;  %v330_v14 = vadd.f32 %v329_v11, %v278_v9 }
 0x158   : > { %v332_v13 = vpop.f32.mrb[2].mxu0 }
 0x159   : > { %v333_v15 = vadd.f32 %v332_v13, %v279_v10  ;;  %v594_v16 = vpop.f32.mrb[3].mxu0 }
 0x15b   : > { %v336_v17 = vpack.c.bf16 %v333_v15, %v330_v14 }
 0x15d   : > { %604 = vmatmul.mubr.msk.bf16.vlgmr.msra.gmra.mrb[0].mxu1 %vm337_vm3, %v336_v17 }
 0x230   : > { %v408_v18 = vpop.f32.mrb[0].mxu1 }
 0x231   : > { %415 = vst [vmem:[%s1077_s9] sm:$0xff] %v408_v18  ;;  %v605_v19 = vpop.f32.mrb[1].mxu1 }
 0x232   : > { %v411_v20 = vpop.f32.mrb[2].mxu1 }
 0x233   : > { %416 = vst [vmem:[%s1077_s9 + $0x8] sm:$0xff] %v411_v20  ;;  %v606_v21 = vpop.f32.mrb[3].mxu1 }
 0x234   : > { %779 = shalt.err (!%p776_p11)
}
 0x235   : > { %s780_s30 = scalar_lea.hbm %s1085_s25, 256  ;;  %s784_s8 = scalar_lea.hbm %s1136_s3, 512 }
 0x236   : > { %p781_p4 = scmp.ne.s32.totalorder %s1085_s25, %s780_s30  ;;  %p785_p2 = scmp.lt.u32.totalorder %s1085_s25, %s1136_s3 }
 0x237   : > { %p786_p1 = scmp.lt.u32.totalorder %s784_s8, %s780_s30  ;;  %p788_p7 = scmp.lt.u32.totalorder %s780_s30, %s1085_s25 }
 0x238   : > { %p782_p3 = pnand %p781_p4, %p1156_p6 }
 0x239   : > { %p787_p13 = por %p786_p1, %p785_p2 }
 0x23a   : > { %p783_p5 = pneg %p782_p3 }
 0x23b   : > { %p789_p9 = por %p788_p7, %p787_p13 }
 0x23d   : > { %p790_p12 = pnand %p789_p9, %p783_p5 }
 0x23f   : > { %793 = shalt.err (!%p790_p12)
}
 0x240   : > { %s847_s11 = smov 128   ;;  %s848_s27 = smov 8  }
 0x241   : > { %613 = dma.vmem_to_hbm [thread:$0]  (%p1156_p6), %s1087_s7, 256, %s1085_s25, %s418_s5, %s847_s11, %s847_s11, %s848_s27  }
 0x242 PF: > { %s446_s9 = sand.u32 1, %s824_s12   ;;  %p1157_p0 = scmp.ne.s32.totalorder %s1146_s24, 0 }
 0x243   : > { %p1158_p8 = scmp.ge.s32.totalorder %s836_s15, 2  ;;  %s447_s22 = scalar_lea.sflag [#allocation5], %s446_s9 }
 0x245   : > { %p626_p10 = pnand %p1158_p8, %p1157_p0 }
 0x247   : > { %819 = dma.done.wait (!%p626_p10), %s447_s22, 256  }
 0x248   : > { %821 = vsyncadd (!%p626_p10), %s447_s22, 4294967040  ;;  %p19_p11 = scmp.ge.s32.totalorder %s894_s18, 4   ;;  %s1159_s12 = smov %s828_s13 }
 0x249   : > { %s1160_s13 = smov %s832_s14  ;;  %s1161_s14 = smov %s906_s21 }
 0x24a   : > { %s1162_s15 = smov %s894_s18  ;;  %21 = sbr.rel (!%p19_p11) target bundleno = 9 (0x9), region = 105 }
 0x251   :  { %452 = vsyncpa [#allocation4], 1 }
 0x252   :  { %454 = vsyncpa [#allocation4 + $0x1], 1 }
 0x253   :  { %455 = vsyncpa [#allocation7], 1 }
 0x254   :  { %457 = vsyncpa [#allocation7 + $0x1], 1 }
 0x255   :  { %458 = vsyncpa [#allocation5], 1 }
 0x256   :  { %460 = vsyncpa [#allocation5 + $0x1], 1 }

</bundles_post_ra>
